<compile_context>
chip_gen: v5e
topology: v5e:2x2
jax: 0.10.0
libtpu: 0.0.40
codegen_flags: <defaults>
</compile_context>

<pallas_src>
import jax
import jax.numpy as jnp
from jax.experimental import pallas as pl
from jax.experimental.pallas import tpu as pltpu


# --------------------------------------------------------------------------- #
# Kernels
# --------------------------------------------------------------------------- #
def _head_kernel_batched(x_ref, w_ref, b_ref, o_ref):
    """Collapsed-grid path: whole (Bb, Cin, HW) slab per step (tiny maps).

    x_ref: (Bb, Cin, HW)   NCHW-native trunk features
    w_ref: (Cout, Cin)     1x1-conv weight with BN scale pre-folded
    b_ref: (Cout, 1)       folded bias
    o_ref: (Bb, Cout, HW)  output, already NCHW
    """
    w = w_ref[...]
    b = b_ref[...]
    for bi in range(x_ref.shape[0]):                    # static, small unroll
        y = jnp.dot(w, x_ref[bi], preferred_element_type=jnp.float32)
        o_ref[bi] = jnp.maximum(y + b, 0.0).astype(o_ref.dtype)


def _head_kernel_tiled(x_ref, w_ref, b_ref, o_ref):
    """Tiled path: one (batch, HW-tile) block per step (large maps).

    x_ref: (1, Cin, T), w_ref: (Cout, Cin), b_ref: (Cout, 1), o_ref: (1, Cout, T)
    """
    y = jnp.dot(w_ref[...], x_ref[0], preferred_element_type=jnp.float32)
    o_ref[0] = jnp.maximum(y + b_ref[...], 0.0).astype(o_ref.dtype)


# --------------------------------------------------------------------------- #
# Parameter folding (done ONCE, outside the per-forward path)
# --------------------------------------------------------------------------- #
def fold_bn_into_conv1x1(conv_w, conv_b, gamma, beta, run_mean, run_var,
                         *, eps=1e-5, weight_dtype=jnp.float32):
    """Fold eval-mode BatchNorm2d into the 1x1 conv:
         y = (w * scale) @ x + (beta + scale * (conv_b - mean))
    Returns (w_scaled [Cout, Cin], bias [Cout, 1])."""
    Cout, Cin = conv_w.shape[0], conv_w.shape[1]
    scale = gamma / jnp.sqrt(run_var + eps)                          # (Cout,)
    w_scaled = (conv_w.reshape(Cout, Cin) * scale[:, None]).astype(weight_dtype)
    bias = (beta + scale * (conv_b - run_mean)).reshape(Cout, 1).astype(jnp.float32)
    return w_scaled, bias


# --------------------------------------------------------------------------- #
# Forward wrapper
# --------------------------------------------------------------------------- #
def backbone_head(feat_nchw, w_scaled, bias):
    """Conv1x1(Cin->Cout) + folded BatchNorm + ReLU as one Pallas kernel.

    feat_nchw: (B, Cin, H, W)   trunk output (f32 or bf16)
    w_scaled:  (Cout, Cin)      from fold_bn_into_conv1x1
    bias:      (Cout, 1)        from fold_bn_into_conv1x1
    returns:   (B, Cout, H, W)  same dtype as feat_nchw
    """
    B, Cin, H, W = feat_nchw.shape
    Cout = w_scaled.shape[0]
    HW = H * W
    out_dtype = feat_nchw.dtype

    # Free, contiguous reshape: NCHW -> (B, Cin, H*W). No transpose.
    x = feat_nchw.reshape(B, Cin, HW)

    itemsize = jnp.dtype(out_dtype).itemsize
    x_bytes_per_b = Cin * HW * itemsize

    # ---- Path A: tiny / ragged maps (the module's real 5x5 / 7x7 case) ----
    # Collapse the grid: one (Bb, Cin, HW) slab per step, usually grid=(1,).
    if HW % 128 != 0 and x_bytes_per_b <= (2 << 20):
        Bb = B
        # keep the x block <= ~8 MiB (double-buffer headroom on all gens) and
        # Bb an exact divisor of B so blocks tile the batch cleanly.
        while Bb > 1 and (Bb * x_bytes_per_b > (8 << 20) or B % Bb != 0):
            Bb -= 1
        grid = (B // Bb,)
        out = pl.pallas_call(
            _head_kernel_batched,
            out_shape=jax.ShapeDtypeStruct((B, Cout, HW), out_dtype),
            grid=grid,
            in_specs=[
                pl.BlockSpec((Bb, Cin, HW), lambda g: (g, 0, 0)),   # x slab
                pl.BlockSpec((Cout, Cin), lambda g: (0, 0)),        # weight
                pl.BlockSpec((Cout, 1), lambda g: (0, 0)),          # bias
            ],
            out_specs=pl.BlockSpec((Bb, Cout, HW), lambda g: (g, 0, 0)),
            compiler_params=pltpu.CompilerParams(
                dimension_semantics=("parallel",)),
        )(x, w_scaled, bias)
        return out.reshape(B, Cout, H, W)

    # ---- Path B: large maps -- lane-dense 128-multiple spatial tiles --------
    # Ragged large HW: pad once to a 128 multiple (restores unmasked stores
    # and bounded block sizes), slice back afterwards.
    HW_pad = ((HW + 127) // 128) * 128
    if HW_pad != HW:
        x = jnp.pad(x, ((0, 0), (0, 0), (0, HW_pad - HW)))

    tile_hw = 128
    for t in (2048, 1024, 512, 256, 128):   # 2048 cap fits default VMEM on
        if HW_pad % t == 0:                 # v5e/v6e/v7x with double buffering
            tile_hw = t
            break

    grid = (B, HW_pad // tile_hw)
    out = pl.pallas_call(
        _head_kernel_tiled,
        out_shape=jax.ShapeDtypeStruct((B, Cout, HW_pad), out_dtype),
        grid=grid,
        in_specs=[
            pl.BlockSpec((1, Cin, tile_hw), lambda b, j: (b, 0, j)),  # x tile
            pl.BlockSpec((Cout, Cin), lambda b, j: (0, 0)),           # weight
            pl.BlockSpec((Cout, 1), lambda b, j: (0, 0)),             # bias
        ],
        out_specs=pl.BlockSpec((1, Cout, tile_hw), lambda b, j: (b, 0, j)),
        compiler_params=pltpu.CompilerParams(
            dimension_semantics=("parallel", "parallel")),
    )(x, w_scaled, bias)

    if HW_pad != HW:
        out = out[:, :, :HW]
    return out.reshape(B, Cout, H, W)


# --------------------------------------------------------------------------- #
# Plain-JAX reference
# --------------------------------------------------------------------------- #
def reference_head(feat_nchw, conv_w, conv_b, gamma, beta, run_mean, run_var,
                   eps=1e-5):
    B, Cin, H, W = feat_nchw.shape
    Cout = conv_w.shape[0]
    x = jnp.transpose(feat_nchw, (0, 2, 3, 1)).reshape(-1, Cin)
    y = x @ conv_w.reshape(Cout, Cin).T + conv_b
    y = (y - run_mean) / jnp.sqrt(run_var + eps) * gamma + beta
    y = jnp.maximum(y, 0.0)
    return jnp.transpose(y.reshape(B, H, W, Cout), (0, 3, 1, 2))


if __name__ == "__main__":
    key = jax.random.PRNGKey(0)
    k_feat, k_w, k_b = jax.random.split(key, 3)

    # resnet18_1x1conv variant: trunk emits 512-channel 5x5 maps; head -> 64 ch.
    B, Cin, H, W = 2, 512, 5, 5
    Cout = 64

    # Synthetic trunk output (stands in for the pretrained resnet18 features).
    feat = jax.random.normal(k_feat, (B, Cin, H, W), dtype=jnp.float32)

    # Deterministic parameter init (shapes from nn.Conv2d / nn.BatchNorm2d).
    conv_w = jax.random.normal(k_w, (Cout, Cin, 1, 1), dtype=jnp.float32) * 0.02
    conv_b = jax.random.normal(k_b, (Cout,), dtype=jnp.float32) * 0.01
    gamma = jnp.ones((Cout,), jnp.float32)
    beta = jnp.zeros((Cout,), jnp.float32)
    run_mean = jnp.zeros((Cout,), jnp.float32)
    run_var = jnp.ones((Cout,), jnp.float32)

    # BN fold is hoisted: computed ONCE, not per forward.
    w_scaled, bias = fold_bn_into_conv1x1(
        conv_w, conv_b, gamma, beta, run_mean, run_var)
    w_scaled = jax.block_until_ready(w_scaled)
    bias = jax.block_until_ready(bias)

    out = backbone_head(feat, w_scaled, bias)
    out = jax.block_until_ready(out)

    ref = reference_head(feat, conv_w, conv_b, gamma, beta, run_mean, run_var)
    assert out.shape == (B, Cout, H, W), out.shape
    assert jnp.allclose(out, ref, atol=1e-4, rtol=1e-4), "mismatch vs reference"

    # Also exercise the lane-dense tiled path once (128-multiple HW).
    B2, H2, W2 = 2, 16, 16
    feat2 = jax.random.normal(k_feat, (B2, Cin, H2, W2), dtype=jnp.float32)
    out2 = jax.block_until_ready(backbone_head(feat2, w_scaled, bias))
    ref2 = reference_head(feat2, conv_w, conv_b, gamma, beta, run_mean, run_var)
    assert jnp.allclose(out2, ref2, atol=1e-4, rtol=1e-4), "mismatch (tiled path)"

    print("KERNEL_OK")
</pallas_src>

<mosaic_0001>
module attributes {stable_mosaic.version = 11 : i64} {
  func.func @_head_kernel_batched(%arg0: i32, %arg1: memref<2x512x25xf32, #tpu.memory_space<vmem>>, %arg2: memref<64x512xf32, #tpu.memory_space<vmem>>, %arg3: memref<64x1xf32, #tpu.memory_space<vmem>>, %arg4: memref<2x64x25xf32, #tpu.memory_space<vmem>>) attributes {dimension_semantics = [#tpu.dimension_semantics<parallel>], iteration_bounds = array<i64: 1>, scalar_prefetch = 0 : i64, scratch_operands = 0 : i64, tpu.core_type = #tpu.core_type<tc>, window_params = [{transform_indices = @transform_0, window_bounds = array<i64: 2, 512, 25>}, {pipeline_mode = #tpu.pipeline_mode<synchronous>, transform_indices = @transform_1, window_bounds = array<i64: 64, 512>}, {pipeline_mode = #tpu.pipeline_mode<synchronous>, transform_indices = @transform_2, window_bounds = array<i64: 64, 1>}, {transform_indices = @transform_3, window_bounds = array<i64: 2, 64, 25>}]} {
    %c0 = arith.constant 0 : index
    %c0_0 = arith.constant 0 : index
    %0 = vector.load %arg2[%c0, %c0_0] : memref<64x512xf32, #tpu.memory_space<vmem>>, vector<64x512xf32>
    %c0_1 = arith.constant 0 : index
    %c0_2 = arith.constant 0 : index
    %1 = vector.load %arg3[%c0_1, %c0_2] : memref<64x1xf32, #tpu.memory_space<vmem>>, vector<64x1xf32>
    %c0_3 = arith.constant 0 : index
    %c0_4 = arith.constant 0 : index
    %c0_5 = arith.constant 0 : index
    %2 = vector.load %arg1[%c0_3, %c0_4, %c0_5] : memref<2x512x25xf32, #tpu.memory_space<vmem>>, vector<1x512x25xf32>
    %3 = vector.shape_cast %2 : vector<1x512x25xf32> to vector<512x25xf32>
    %cst = arith.constant dense<0.000000e+00> : vector<64x25xf32>
    %4 = tpu.matmul %0, %3, %cst {dimension_numbers = #tpu.dot_dimension_numbers<[1], [0], [0], [1], [0, 0, 1, 1], [], []>} : vector<64x512xf32>, vector<512x25xf32>, vector<64x25xf32> -> vector<64x25xf32>
    %5 = vector.broadcast %1 : vector<64x1xf32> to vector<64x25xf32>
    %6 = arith.addf %4, %5 : vector<64x25xf32>
    %cst_6 = arith.constant 0.000000e+00 : f32
    %7 = vector.broadcast %cst_6 : f32 to vector<64x25xf32>
    %8 = arith.maximumf %6, %7 : vector<64x25xf32>
    %c0_7 = arith.constant 0 : index
    %c0_8 = arith.constant 0 : index
    %c0_9 = arith.constant 0 : index
    %9 = vector.load %arg4[%c0_7, %c0_8, %c0_9] : memref<2x64x25xf32, #tpu.memory_space<vmem>>, vector<1x64x25xf32>
    %10 = vector.shape_cast %9 : vector<1x64x25xf32> to vector<64x25xf32>
    %11 = vector.shape_cast %8 : vector<64x25xf32> to vector<1x64x25xf32>
    tpu.vector_store %arg4[%c0_7, %c0_8, %c0_9], %11 {strides = array<i32>} : memref<2x64x25xf32, #tpu.memory_space<vmem>>, vector<1x64x25xf32>,
    %c1 = arith.constant 1 : index
    %c0_10 = arith.constant 0 : index
    %c0_11 = arith.constant 0 : index
    %12 = vector.load %arg1[%c1, %c0_10, %c0_11] : memref<2x512x25xf32, #tpu.memory_space<vmem>>, vector<1x512x25xf32>
    %13 = vector.shape_cast %12 : vector<1x512x25xf32> to vector<512x25xf32>
    %cst_12 = arith.constant dense<0.000000e+00> : vector<64x25xf32>
    %14 = tpu.matmul %0, %13, %cst_12 {dimension_numbers = #tpu.dot_dimension_numbers<[1], [0], [0], [1], [0, 0, 1, 1], [], []>} : vector<64x512xf32>, vector<512x25xf32>, vector<64x25xf32> -> vector<64x25xf32>
    %15 = vector.broadcast %1 : vector<64x1xf32> to vector<64x25xf32>
    %16 = arith.addf %14, %15 : vector<64x25xf32>
    %cst_13 = arith.constant 0.000000e+00 : f32
    %17 = vector.broadcast %cst_13 : f32 to vector<64x25xf32>
    %18 = arith.maximumf %16, %17 : vector<64x25xf32>
    %c1_14 = arith.constant 1 : index
    %c0_15 = arith.constant 0 : index
    %c0_16 = arith.constant 0 : index
    %19 = vector.load %arg4[%c1_14, %c0_15, %c0_16] : memref<2x64x25xf32, #tpu.memory_space<vmem>>, vector<1x64x25xf32>
    %20 = vector.shape_cast %19 : vector<1x64x25xf32> to vector<64x25xf32>
    %21 = vector.shape_cast %18 : vector<64x25xf32> to vector<1x64x25xf32>
    tpu.vector_store %arg4[%c1_14, %c0_15, %c0_16], %21 {strides = array<i32>} : memref<2x64x25xf32, #tpu.memory_space<vmem>>, vector<1x64x25xf32>,
    return
  }
  func.func @transform_0(%arg0: i32) -> (i32, i32, i32) {
    %c0_i32 = arith.constant 0 : i32
    %c0_i32_0 = arith.constant 0 : i32
    %c0_i32_1 = arith.constant 0 : i32
    return %arg0, %c0_i32, %c0_i32_0 : i32, i32, i32
  }
  func.func @transform_1(%arg0: i32) -> (i32, i32) {
    %c0_i32 = arith.constant 0 : i32
    %c0_i32_0 = arith.constant 0 : i32
    %c0_i32_1 = arith.constant 0 : i32
    return %c0_i32, %c0_i32_0 : i32, i32
  }
  func.func @transform_2(%arg0: i32) -> (i32, i32) {
    %c0_i32 = arith.constant 0 : i32
    %c0_i32_0 = arith.constant 0 : i32
    %c0_i32_1 = arith.constant 0 : i32
    return %c0_i32, %c0_i32_0 : i32, i32
  }
  func.func @transform_3(%arg0: i32) -> (i32, i32, i32) {
    %c0_i32 = arith.constant 0 : i32
    %c0_i32_0 = arith.constant 0 : i32
    %c0_i32_1 = arith.constant 0 : i32
    return %arg0, %c0_i32, %c0_i32_0 : i32, i32, i32
  }
}

</mosaic_0001>

<bundles_post_ra>
// kernel: tpu_custom_call.1
= control target key start
LH: loop header
LB: loop body
LE: loop exit
PB: predicated region body
PF: predicated region fallthrough
CT: control target
= control target key end

     0   :  { %vm330_vm0 = vcmask 203776   ;;  %s1385_s0 = inlined_call_operand.vmem [shape: f32[2,512,25], index: 0, kind: input, shape index: {}]   ;;  %s1386_s1 = inlined_call_operand.vmem [shape: f32[64,512], index: 1, kind: input, shape index: {}]   ;;  %s1387_s2 = inlined_call_operand.vmem [shape: f32[64,1], index: 2, kind: input, shape index: {}]   ;;  %s1388_s3 = inlined_call_operand.vmem [shape: f32[2,64,25], index: 3, kind: output, shape index: {}]  }
   0x1   :  { %v69_v0 = vld [vmem:[%s1385_s0 + $0x78] sm:$0xff]  ;;  %v68_v2 = vld [vmem:[%s1385_s0 + $0x70] sm:$0xff]  ;;  %v67_v6 = vld [vmem:[%s1385_s0 + $0x68] sm:$0xff] }
   0x2   :  { %v101_v1 = vld [vmem:[%s1385_s0 + $0x178] sm:$0xff]  ;;  %158 = vmatpush.msra.mxu0 %v69_v0  ;;  %v100_v4 = vld [vmem:[%s1385_s0 + $0x170] sm:$0xff]  ;;  %v99_v8 = vld [vmem:[%s1385_s0 + $0x168] sm:$0xff] }
   0x3   :  { %240 = vmatpush.msra.mxu2 %v101_v1  ;;  %v85_v3 = vld [vmem:[%s1385_s0 + $0xf8] sm:$0xff]  ;;  %v84_v7 = vld [vmem:[%s1385_s0 + $0xf0] sm:$0xff]  ;;  %v83_v10 = vld [vmem:[%s1385_s0 + $0xe8] sm:$0xff] }
   0x4   :  { %v117_v5 = vld [vmem:[%s1385_s0 + $0x1f8] sm:$0xff]  ;;  %199 = vmatpush.msra.mxu1 %v85_v3  ;;  %159 = vmatpush.msra.mxu0 %v68_v2  ;;  %v116_v9 = vld [vmem:[%s1385_s0 + $0x1f0] sm:$0xff]  ;;  %v66_v11 = vld [vmem:[%s1385_s0 + $0x60] sm:$0xff] }
   0x5   :  { %281 = vmatpush.msra.mxu3 %v117_v5  ;;  %241 = vmatpush.msra.mxu2 %v100_v4  ;;  %v98_v12 = vld [vmem:[%s1385_s0 + $0x160] sm:$0xff]  ;;  %v115_v13 = vld [vmem:[%s1385_s0 + $0x1e8] sm:$0xff]  ;;  %v65_v16 = vld [vmem:[%s1385_s0 + $0x58] sm:$0xff] }
   0x6   :  { %200 = vmatpush.msra.mxu1 %v84_v7  ;;  %160 = vmatpush.msra.mxu0 %v67_v6  ;;  %v82_v14 = vld [vmem:[%s1385_s0 + $0xe0] sm:$0xff]  ;;  %v97_v17 = vld [vmem:[%s1385_s0 + $0x158] sm:$0xff]  ;;  %v64_v20 = vld [vmem:[%s1385_s0 + $0x50] sm:$0xff] }
   0x7   :  { %282 = vmatpush.msra.mxu3 %v116_v9  ;;  %242 = vmatpush.msra.mxu2 %v99_v8  ;;  %v114_v15 = vld [vmem:[%s1385_s0 + $0x1e0] sm:$0xff]  ;;  %v81_v18 = vld [vmem:[%s1385_s0 + $0xd8] sm:$0xff]  ;;  %v96_v21 = vld [vmem:[%s1385_s0 + $0x150] sm:$0xff] }
   0x8   :  { %201 = vmatpush.msra.mxu1 %v83_v10  ;;  %161 = vmatpush.msra.mxu0 %v66_v11  ;;  %v113_v19 = vld [vmem:[%s1385_s0 + $0x1d8] sm:$0xff]  ;;  %v80_v22 = vld [vmem:[%s1385_s0 + $0xd0] sm:$0xff]  ;;  %v63_v24 = vld [vmem:[%s1385_s0 + $0x48] sm:$0xff] }
   0x9   :  { %283 = vmatpush.msra.mxu3 %v115_v13  ;;  %243 = vmatpush.msra.mxu2 %v98_v12  ;;  %v112_v23 = vld [vmem:[%s1385_s0 + $0x1d0] sm:$0xff]  ;;  %v95_v25 = vld [vmem:[%s1385_s0 + $0x148] sm:$0xff]  ;;  %v62_v28 = vld [vmem:[%s1385_s0 + $0x40] sm:$0xff] }
   0xa   :  { %202 = vmatpush.msra.mxu1 %v82_v14  ;;  %162 = vmatpush.msra.mxu0 %v65_v16  ;;  %v79_v26 = vld [vmem:[%s1385_s0 + $0xc8] sm:$0xff]  ;;  %v94_v29 = vld [vmem:[%s1385_s0 + $0x140] sm:$0xff]  ;;  %v61_v32 = vld [vmem:[%s1385_s0 + $0x38] sm:$0xff] }
   0xb   :  { %284 = vmatpush.msra.mxu3 %v114_v15  ;;  %244 = vmatpush.msra.mxu2 %v97_v17  ;;  %v111_v27 = vld [vmem:[%s1385_s0 + $0x1c8] sm:$0xff]  ;;  %v78_v30 = vld [vmem:[%s1385_s0 + $0xc0] sm:$0xff]  ;;  %v93_v33 = vld [vmem:[%s1385_s0 + $0x138] sm:$0xff] }
   0xc   :  { %203 = vmatpush.msra.mxu1 %v81_v18  ;;  %163 = vmatpush.msra.mxu0 %v64_v20  ;;  %v110_v31 = vld [vmem:[%s1385_s0 + $0x1c0] sm:$0xff]  ;;  %v77_v34 = vld [vmem:[%s1385_s0 + $0xb8] sm:$0xff]  ;;  %v60_v36 = vld [vmem:[%s1385_s0 + $0x30] sm:$0xff] }
   0xd   :  { %285 = vmatpush.msra.mxu3 %v113_v19  ;;  %245 = vmatpush.msra.mxu2 %v96_v21  ;;  %v109_v35 = vld [vmem:[%s1385_s0 + $0x1b8] sm:$0xff]  ;;  %v92_v37 = vld [vmem:[%s1385_s0 + $0x130] sm:$0xff]  ;;  %v59_v40 = vld [vmem:[%s1385_s0 + $0x28] sm:$0xff]  ;;  %v665_v21 = vmov 0  }
   0xe   :  { %204 = vmatpush.msra.mxu1 %v80_v22  ;;  %164 = vmatpush.msra.mxu0 %v63_v24  ;;  %v76_v38 = vld [vmem:[%s1385_s0 + $0xb0] sm:$0xff]  ;;  %v91_v41 = vld [vmem:[%s1385_s0 + $0x128] sm:$0xff]  ;;  %v58_v44 = vld [vmem:[%s1385_s0 + $0x20] sm:$0xff] }
   0xf   :  { %286 = vmatpush.msra.mxu3 %v112_v23  ;;  %246 = vmatpush.msra.mxu2 %v95_v25  ;;  %v108_v39 = vld [vmem:[%s1385_s0 + $0x1b0] sm:$0xff]  ;;  %v75_v42 = vld [vmem:[%s1385_s0 + $0xa8] sm:$0xff]  ;;  %v90_v45 = vld [vmem:[%s1385_s0 + $0x120] sm:$0xff] }
  0x10   :  { %205 = vmatpush.msra.mxu1 %v79_v26  ;;  %165 = vmatpush.msra.mxu0 %v62_v28  ;;  %v107_v43 = vld [vmem:[%s1385_s0 + $0x1a8] sm:$0xff]  ;;  %v74_v46 = vld [vmem:[%s1385_s0 + $0xa0] sm:$0xff]  ;;  %v57_v48 = vld [vmem:[%s1385_s0 + $0x18] sm:$0xff] }
  0x11   :  { %287 = vmatpush.msra.mxu3 %v111_v27  ;;  %247 = vmatpush.msra.mxu2 %v94_v29  ;;  %v106_v47 = vld [vmem:[%s1385_s0 + $0x1a0] sm:$0xff]  ;;  %v89_v49 = vld [vmem:[%s1385_s0 + $0x118] sm:$0xff]  ;;  %v56_v52 = vld [vmem:[%s1385_s0 + $0x10] sm:$0xff] }
  0x12   :  { %206 = vmatpush.msra.mxu1 %v78_v30  ;;  %166 = vmatpush.msra.mxu0 %v61_v32  ;;  %v73_v50 = vld [vmem:[%s1385_s0 + $0x98] sm:$0xff]  ;;  %v88_v53 = vld [vmem:[%s1385_s0 + $0x110] sm:$0xff]  ;;  %v55_v56 = vld [vmem:[%s1385_s0 + $0x8] sm:$0xff] }
  0x13   :  { %288 = vmatpush.msra.mxu3 %v110_v31  ;;  %248 = vmatpush.msra.mxu2 %v93_v33  ;;  %v105_v51 = vld [vmem:[%s1385_s0 + $0x198] sm:$0xff]  ;;  %v72_v54 = vld [vmem:[%s1385_s0 + $0x90] sm:$0xff]  ;;  %v87_v57 = vld [vmem:[%s1385_s0 + $0x108] sm:$0xff] }
  0x14   :  { %207 = vmatpush.msra.mxu1 %v77_v34  ;;  %167 = vmatpush.msra.mxu0 %v60_v36  ;;  %v104_v55 = vld [vmem:[%s1385_s0 + $0x190] sm:$0xff]  ;;  %v71_v58 = vld [vmem:[%s1385_s0 + $0x88] sm:$0xff]  ;;  %v54_v60 = vld [vmem:[%s1385_s0] sm:$0xff] }
  0x15   :  { %289 = vmatpush.msra.mxu3 %v109_v35  ;;  %249 = vmatpush.msra.mxu2 %v92_v37  ;;  %v103_v59 = vld [vmem:[%s1385_s0 + $0x188] sm:$0xff]  ;;  %v86_v61 = vld [vmem:[%s1385_s0 + $0x100] sm:$0xff]  ;;  %v880_v63 = vld [vmem:[%s1386_s1 + $0x10] sm:$0xff] }
  0x16   :  { %208 = vmatpush.msra.mxu1 %v76_v38  ;;  %168 = vmatpush.msra.mxu0 %v59_v40  ;;  %v875_v62 = vld [vmem:[%s1386_s1] sm:$0xff]  ;;  %v636_v0 = vld [vmem:[%s1385_s0 + $0x378] sm:$0xff]  ;;  %v894_v3 = vld [vmem:[%s1386_s1 + $0x8] sm:$0xff] }
  0x17   :  { %290 = vmatpush.msra.mxu3 %v108_v39  ;;  %250 = vmatpush.msra.mxu2 %v91_v41  ;;  %v70_v1 = vld [vmem:[%s1385_s0 + $0x80] sm:$0xff]  ;;  %v901_v4 = vld [vmem:[%s1386_s1 + $0x18] sm:$0xff]  ;;  %v635_v8 = vld [vmem:[%s1385_s0 + $0x370] sm:$0xff] }
  0x18   :  { %209 = vmatpush.msra.mxu1 %v75_v42  ;;  %169 = vmatpush.msra.mxu0 %v58_v44  ;;  %v102_v2 = vld [vmem:[%s1385_s0 + $0x180] sm:$0xff]  ;;  %v604_v5 = vld [vmem:[%s1385_s0 + $0x278] sm:$0xff]  ;;  %v603_v9 = vld [vmem:[%s1385_s0 + $0x270] sm:$0xff] }
  0x19   :  { %291 = vmatpush.msra.mxu3 %v107_v43  ;;  %251 = vmatpush.msra.mxu2 %v90_v45  ;;  %v652_v6 = vld [vmem:[%s1385_s0 + $0x3f8] sm:$0xff]  ;;  %v651_v10 = vld [vmem:[%s1385_s0 + $0x3f0] sm:$0xff]  ;;  %v634_v12 = vld [vmem:[%s1385_s0 + $0x368] sm:$0xff] }
  0x1a   :  { %210 = vmatpush.msra.mxu1 %v74_v46  ;;  %170 = vmatpush.msra.mxu0 %v57_v48  ;;  %v620_v7 = vld [vmem:[%s1385_s0 + $0x2f8] sm:$0xff]  ;;  %v619_v11 = vld [vmem:[%s1385_s0 + $0x2f0] sm:$0xff]  ;;  %v602_v13 = vld [vmem:[%s1385_s0 + $0x268] sm:$0xff] }
  0x1b   :  { %292 = vmatpush.msra.mxu3 %v106_v47  ;;  %252 = vmatpush.msra.mxu2 %v89_v49  ;;  %v935_v14 = vld [vmem:[%s1386_s1 + $0x20] sm:$0xff]  ;;  %v940_v15 = vld [vmem:[%s1386_s1 + $0x30] sm:$0xff]  ;;  %v650_v16 = vld [vmem:[%s1385_s0 + $0x3e8] sm:$0xff] }
  0x1c   :  { %211 = vmatpush.msra.mxu1 %v73_v50  ;;  %171 = vmatpush.msra.mxu0 %v56_v52  ;;  %v948_v17 = vld [vmem:[%s1386_s1 + $0x28] sm:$0xff]  ;;  %v633_v18 = vld [vmem:[%s1385_s0 + $0x360] sm:$0xff]  ;;  %v958_v19 = vld [vmem:[%s1386_s1 + $0x38] sm:$0xff] }
  0x1d   :  { %293 = vmatpush.msra.mxu3 %v105_v51  ;;  %253 = vmatpush.msra.mxu2 %v88_v53  ;;  %v618_v20 = vld [vmem:[%s1385_s0 + $0x2e8] sm:$0xff]  ;;  %v46_v22 = vld [vmem:[%s1387_s2] sm:$0xff]  ;;  %v632_v26 = vld [vmem:[%s1385_s0 + $0x358] sm:$0xff] }
  0x1e   :  { %212 = vmatpush.msra.mxu1 %v72_v54  ;;  %172 = vmatpush.msra.mxu0 %v55_v56  ;;  %v601_v23 = vld [vmem:[%s1385_s0 + $0x260] sm:$0xff]  ;;  %v600_v27 = vld [vmem:[%s1385_s0 + $0x258] sm:$0xff]  ;;  %v998_v31 = vld [vmem:[%s1386_s1 + $0x50] sm:$0xff] }
  0x1f   :  { %294 = vmatpush.msra.mxu3 %v104_v55  ;;  %254 = vmatpush.msra.mxu2 %v87_v57  ;;  %v649_v24 = vld [vmem:[%s1385_s0 + $0x3e0] sm:$0xff]  ;;  %v648_v28 = vld [vmem:[%s1385_s0 + $0x3d8] sm:$0xff]  ;;  %v631_v32 = vld [vmem:[%s1385_s0 + $0x350] sm:$0xff] }
  0x20   :  { %213 = vmatpush.msra.mxu1 %v71_v58  ;;  %173 = vmatpush.msra.mxu0 %v54_v60  ;;  %v617_v25 = vld [vmem:[%s1385_s0 + $0x2e0] sm:$0xff]  ;;  %v616_v29 = vld [vmem:[%s1385_s0 + $0x2d8] sm:$0xff]  ;;  %v599_v33 = vld [vmem:[%s1385_s0 + $0x250] sm:$0xff] }
  0x21   :  { %295 = vmatpush.msra.mxu3 %v103_v59  ;;  %255 = vmatpush.msra.mxu2 %v86_v61  ;;  %v993_v30 = vld [vmem:[%s1386_s1 + $0x40] sm:$0xff]  ;;  %v1009_v34 = vld [vmem:[%s1386_s1 + $0x48] sm:$0xff]  ;;  %v647_v35 = vld [vmem:[%s1385_s0 + $0x3d0] sm:$0xff] }
  0x22   :  { %174 = vmatmul.f32.vlgmr.msra.gmra.mxu0 %v875_v62  ;;  %256 = vmatmul.f32.vlgmr.msra.gmra.mxu2 %v880_v63  ;;  %v1019_v36 = vld [vmem:[%s1386_s1 + $0x58] sm:$0xff]  ;;  %v615_v37 = vld [vmem:[%s1385_s0 + $0x2d0] sm:$0xff]  ;;  %v47_v38 = vld [vmem:[%s1387_s2 + $0x8] sm:$0xff] }
  0x23   :  { %486 = vmatpush.msrb.mxu2 %v636_v0  ;;  %214 = vmatpush.msra.mxu1 %v70_v1  ;;  %v630_v39 = vld [vmem:[%s1385_s0 + $0x348] sm:$0xff]  ;;  %v629_v43 = vld [vmem:[%s1385_s0 + $0x340] sm:$0xff]  ;;  %v48_v44 = vld [vmem:[%s1387_s2 + $0x10] sm:$0xff] }
  0x24   :  { %296 = vmatpush.msra.mxu3 %v102_v2  ;;  %215 = vmatmul.f32.vlgmr.msra.gmra.mxu1 %v894_v3  ;;  %v598_v40 = vld [vmem:[%s1385_s0 + $0x248] sm:$0xff]  ;;  %v1050_v45 = vld [vmem:[%s1386_s1 + $0x60] sm:$0xff]  ;;  %v1055_v46 = vld [vmem:[%s1386_s1 + $0x70] sm:$0xff] }
  0x25   :  { %297 = vmatmul.f32.vlgmr.msra.gmra.mxu3 %v901_v4  ;;  %404 = vmatpush.msrb.mxu0 %v604_v5  ;;  %v646_v41 = vld [vmem:[%s1385_s0 + $0x3c8] sm:$0xff]  ;;  %v597_v47 = vld [vmem:[%s1385_s0 + $0x240] sm:$0xff]  ;;  %v628_v50 = vld [vmem:[%s1385_s0 + $0x338] sm:$0xff] }
  0x26   :  { %527 = vmatpush.msrb.mxu3 %v652_v6  ;;  %445 = vmatpush.msrb.mxu1 %v620_v7  ;;  %v614_v42 = vld [vmem:[%s1385_s0 + $0x2c8] sm:$0xff]  ;;  %v645_v48 = vld [vmem:[%s1385_s0 + $0x3c0] sm:$0xff]  ;;  %v1077_v51 = vld [vmem:[%s1386_s1 + $0x78] sm:$0xff] }
  0x27   :  { %487 = vmatpush.msrb.mxu2 %v635_v8  ;;  %405 = vmatpush.msrb.mxu0 %v603_v9  ;;  %v1067_v49 = vld [vmem:[%s1386_s1 + $0x68] sm:$0xff]  ;;  %v613_v52 = vld [vmem:[%s1385_s0 + $0x2c0] sm:$0xff]  ;;  %v596_v53 = vld [vmem:[%s1385_s0 + $0x238] sm:$0xff] }
  0x28   :  { %528 = vmatpush.msrb.mxu3 %v651_v10  ;;  %446 = vmatpush.msrb.mxu1 %v619_v11  ;;  %v644_v54 = vld [vmem:[%s1385_s0 + $0x3b8] sm:$0xff]  ;;  %v627_v56 = vld [vmem:[%s1385_s0 + $0x330] sm:$0xff]  ;;  %v1111_v61 = vld [vmem:[%s1386_s1 + $0x80] sm:$0xff] }
  0x29   :  { %488 = vmatpush.msrb.mxu2 %v634_v12  ;;  %406 = vmatpush.msrb.mxu0 %v602_v13  ;;  %v612_v55 = vld [vmem:[%s1385_s0 + $0x2b8] sm:$0xff]  ;;  %v595_v57 = vld [vmem:[%s1385_s0 + $0x230] sm:$0xff]  ;;  %v626_v1 = vld [vmem:[%s1385_s0 + $0x328] sm:$0xff] }
  0x2a   :  { %177 = vmatmul.f32.gmra.mxu0 %v935_v14  ;;  %259 = vmatmul.f32.gmra.mxu2 %v940_v15  ;;  %v643_v58 = vld [vmem:[%s1385_s0 + $0x3b0] sm:$0xff]  ;;  %v49_v59 = vld [vmem:[%s1387_s2 + $0x18] sm:$0xff]  ;;  %v594_v2 = vld [vmem:[%s1385_s0 + $0x228] sm:$0xff] }
  0x2b   :  { %529 = vmatpush.msrb.mxu3 %v650_v16  ;;  %662 = vset.pattern.permute.xlu0 %v665_v21  ;;  %v611_v60 = vld [vmem:[%s1385_s0 + $0x2b0] sm:$0xff]  ;;  %v1127_v5 = vld [vmem:[%s1386_s1 + $0x88] sm:$0xff]  ;;  %v1137_v7 = vld [vmem:[%s1386_s1 + $0x98] sm:$0xff] }
  0x2c   :  { %218 = vmatmul.f32.gmra.mxu1 %v948_v17  ;;  %489 = vmatpush.msrb.mxu2 %v633_v18  ;;  %v1116_v0 = vld [vmem:[%s1386_s1 + $0x90] sm:$0xff]  ;;  %v642_v6 = vld [vmem:[%s1385_s0 + $0x3a8] sm:$0xff]  ;;  %v625_v9 = vld [vmem:[%s1385_s0 + $0x320] sm:$0xff] }
  0x2d   :  { %300 = vmatmul.f32.gmra.mxu3 %v958_v19  ;;  %447 = vmatpush.msrb.mxu1 %v618_v20  ;;  %v610_v8 = vld [vmem:[%s1385_s0 + $0x2a8] sm:$0xff]  ;;  %v593_v10 = vld [vmem:[%s1385_s0 + $0x220] sm:$0xff]  ;;  %v624_v13 = vld [vmem:[%s1385_s0 + $0x318] sm:$0xff] }
  0x2e   :  { %120 = vperm.xlu0 %662, %v46_v22   ;;  %407 = vmatpush.msrb.mxu0 %v601_v23  ;;  %v641_v11 = vld [vmem:[%s1385_s0 + $0x3a0] sm:$0xff]  ;;  %v592_v16 = vld [vmem:[%s1385_s0 + $0x218] sm:$0xff]  ;;  %v1176_v23 = vld [vmem:[%s1386_s1 + $0xb0] sm:$0xff] }
  0x2f   :  { %530 = vmatpush.msrb.mxu3 %v649_v24  ;;  %448 = vmatpush.msrb.mxu1 %v617_v25  ;;  %v609_v12 = vld [vmem:[%s1385_s0 + $0x2a0] sm:$0xff]  ;;  %v640_v18 = vld [vmem:[%s1385_s0 + $0x398] sm:$0xff]  ;;  %v623_v24 = vld [vmem:[%s1385_s0 + $0x310] sm:$0xff] }
  0x30   :  { %490 = vmatpush.msrb.mxu2 %v632_v26  ;;  %408 = vmatpush.msrb.mxu0 %v600_v27  ;;  %v608_v20 = vld [vmem:[%s1385_s0 + $0x298] sm:$0xff]  ;;  %v1171_v22 = vld [vmem:[%s1386_s1 + $0xa0] sm:$0xff]  ;;  %v591_v25 = vld [vmem:[%s1385_s0 + $0x210] sm:$0xff] }
  0x31   :  { %531 = vmatpush.msrb.mxu3 %v648_v28  ;;  %449 = vmatpush.msrb.mxu1 %v616_v29  ;;  %v1187_v26 = vld [vmem:[%s1386_s1 + $0xa8] sm:$0xff]  ;;  %v639_v27 = vld [vmem:[%s1385_s0 + $0x390] sm:$0xff]  ;;  %v1197_v28 = vld [vmem:[%s1386_s1 + $0xb8] sm:$0xff] }
  0x32   :  { %180 = vmatmul.f32.gmra.mxu0 %v993_v30  ;;  %262 = vmatmul.f32.gmra.mxu2 %v998_v31  ;;  %v607_v29 = vld [vmem:[%s1385_s0 + $0x290] sm:$0xff] }
  0x33   :  { %491 = vmatpush.msrb.mxu2 %v631_v32  ;;  %409 = vmatpush.msrb.mxu0 %v599_v33  ;;  %v622_v32 = vld [vmem:[%s1385_s0 + $0x308] sm:$0xff] }
  0x34   :  { %221 = vmatmul.f32.gmra.mxu1 %v1009_v34  ;;  %532 = vmatpush.msrb.mxu3 %v647_v35  ;;  %v590_v33 = vld [vmem:[%s1385_s0 + $0x208] sm:$0xff] }
  0x35   :  { %303 = vmatmul.f32.gmra.mxu3 %v1019_v36  ;;  %450 = vmatpush.msrb.mxu1 %v615_v37  ;;  %v638_v35 = vld [vmem:[%s1385_s0 + $0x388] sm:$0xff] }
  0x36   :  { %125 = vperm.xlu0 %662, %v47_v38   ;;  %492 = vmatpush.msrb.mxu2 %v630_v39  ;;  %v606_v37 = vld [vmem:[%s1385_s0 + $0x288] sm:$0xff]  ;;  %v621_v38 = vld [vmem:[%s1385_s0 + $0x300] sm:$0xff]  ;;  %v52_v39 = vld [vmem:[%s1387_s2 + $0x30] sm:$0xff] }
  0x37   :  { %410 = vmatpush.msrb.mxu0 %v598_v40  ;;  %533 = vmatpush.msrb.mxu3 %v646_v41  ;;  %v589_v40 = vld [vmem:[%s1385_s0 + $0x200] sm:$0xff] }
  0x38   :  { %663 = vset.pattern.permute.xlu1 %v665_v21  ;;  %451 = vmatpush.msrb.mxu1 %v614_v42  ;;  %v637_v41 = vld [vmem:[%s1385_s0 + $0x380] sm:$0xff] }
  0x39   :  { %493 = vmatpush.msrb.mxu2 %v629_v43  ;;  %130 = vperm.xlu1 %663, %v48_v44   ;;  %v38_v42 = vld [vmem:[%s1386_s1 + $0xc0] sm:$0xff]  ;;  %v40_v43 = vld [vmem:[%s1386_s1 + $0xd0] sm:$0xff] }
  0x3a   :  { %183 = vmatmul.f32.gmra.mxu0 %v1050_v45  ;;  %265 = vmatmul.f32.gmra.mxu2 %v1055_v46  ;;  %v605_v44 = vld [vmem:[%s1385_s0 + $0x280] sm:$0xff] }
  0x3b   :  { %411 = vmatpush.msrb.mxu0 %v597_v47  ;;  %534 = vmatpush.msrb.mxu3 %v645_v48  ;;  %v39_v47 = vld [vmem:[%s1386_s1 + $0xc8] sm:$0xff]  ;;  %v50_v48 = vld [vmem:[%s1387_s2 + $0x20] sm:$0xff] }
  0x3c   :  { %224 = vmatmul.f32.gmra.mxu1 %v1067_v49  ;;  %494 = vmatpush.msrb.mxu2 %v628_v50  ;;  %v41_v50 = vld [vmem:[%s1386_s1 + $0xd8] sm:$0xff] }
  0x3d   :  { %306 = vmatmul.f32.gmra.mxu3 %v1077_v51  ;;  %452 = vmatpush.msrb.mxu1 %v613_v52  ;;  %v53_v52 = vld [vmem:[%s1387_s2 + $0x38] sm:$0xff] }
  0x3e   :  { %412 = vmatpush.msrb.mxu0 %v596_v53  ;;  %535 = vmatpush.msrb.mxu3 %v644_v54  ;;  %v42_v53 = vld [vmem:[%s1386_s1 + $0xe0] sm:$0xff]  ;;  %v44_v54 = vld [vmem:[%s1386_s1 + $0xf0] sm:$0xff] }
  0x3f   :  { %453 = vmatpush.msrb.mxu1 %v612_v55  ;;  %495 = vmatpush.msrb.mxu2 %v627_v56  ;;  %v43_v55 = vld [vmem:[%s1386_s1 + $0xe8] sm:$0xff]  ;;  %v45_v56 = vld [vmem:[%s1386_s1 + $0xf8] sm:$0xff] }
  0x40   :  { %413 = vmatpush.msrb.mxu0 %v595_v57  ;;  %536 = vmatpush.msrb.mxu3 %v643_v58 }
  0x41   :  { %135 = vperm.xlu1 %663, %v49_v59   ;;  %454 = vmatpush.msrb.mxu1 %v611_v60 }
  0x42   :  { %186 = vmatmul.f32.gmra.mxu0 %v1111_v61  ;;  %268 = vmatmul.f32.gmra.mxu2 %v1116_v0 }
  0x43   :  { %496 = vmatpush.msrb.mxu2 %v626_v1  ;;  %414 = vmatpush.msrb.mxu0 %v594_v2 }
  0x44   :  { %227 = vmatmul.f32.gmra.mxu1 %v1127_v5  ;;  %537 = vmatpush.msrb.mxu3 %v642_v6 }
  0x45   :  { %309 = vmatmul.f32.gmra.mxu3 %v1137_v7  ;;  %455 = vmatpush.msrb.mxu1 %v610_v8 }
  0x46   :  { %497 = vmatpush.msrb.mxu2 %v625_v9  ;;  %415 = vmatpush.msrb.mxu0 %v593_v10 }
  0x47   :  { %538 = vmatpush.msrb.mxu3 %v641_v11  ;;  %456 = vmatpush.msrb.mxu1 %v609_v12 }
  0x48   :  { %498 = vmatpush.msrb.mxu2 %v624_v13  ;;  %416 = vmatpush.msrb.mxu0 %v592_v16 }
  0x49   :  { %539 = vmatpush.msrb.mxu3 %v640_v18  ;;  %457 = vmatpush.msrb.mxu1 %v608_v20 }
  0x4a   :  { %189 = vmatmul.f32.gmra.mxu0 %v1171_v22  ;;  %271 = vmatmul.f32.gmra.mxu2 %v1176_v23 }
  0x4b   :  { %499 = vmatpush.msrb.mxu2 %v623_v24  ;;  %417 = vmatpush.msrb.mxu0 %v591_v25 }
  0x4c   :  { %230 = vmatmul.f32.gmra.mxu1 %v1187_v26  ;;  %540 = vmatpush.msrb.mxu3 %v639_v27 }
  0x4d   :  { %312 = vmatmul.f32.gmra.mxu3 %v1197_v28  ;;  %458 = vmatpush.msrb.mxu1 %v607_v29 }
  0x4e   :  { %500 = vmatpush.msrb.mxu2 %v622_v32  ;;  %418 = vmatpush.msrb.mxu0 %v590_v33 }
  0x4f   :  { %541 = vmatpush.msrb.mxu3 %v638_v35  ;;  %459 = vmatpush.msrb.mxu1 %v606_v37 }
  0x50   :  { %501 = vmatpush.msrb.mxu2 %v621_v38  ;;  %150 = vperm.xlu0 %662, %v52_v39  }
  0x51   :  { %419 = vmatpush.msrb.mxu0 %v589_v40  ;;  %542 = vmatpush.msrb.mxu3 %v637_v41 }
  0x52   :  { %192 = vmatmul.f32.gmra.mxu0 %v38_v42  ;;  %274 = vmatmul.f32.gmra.mxu2 %v40_v43 }
  0x53   :  { %460 = vmatpush.msrb.mxu1 %v605_v44  ;;  %664 = vset.pattern.permute.xlu2 %v665_v21  ;;  %v51_v21 = vld [vmem:[%s1387_s2 + $0x28] sm:$0xff] }
  0x54   :  { %233 = vmatmul.f32.gmra.mxu1 %v39_v47  ;;  %140 = vperm.xlu2 %664, %v50_v48  }
  0x55   :  { %315 = vmatmul.f32.gmra.mxu3 %v41_v50  ;;  %155 = vperm.xlu1 %663, %v53_v52  }
  0x5a   :  { %195 = vmatmul.f32.gmra.mxu0 %v42_v53  ;;  %277 = vmatmul.f32.gmra.mxu2 %v44_v54 }
  0x5c   :  { %236 = vmatmul.f32.gmra.mxu1 %v43_v55  ;;  %145 = vperm.xlu2 %664, %v51_v21  }
  0x5d   :  { %318 = vmatmul.f32.gmra.mxu3 %v45_v56 }
  0x62   :  { %420 = vmatmul.f32.vlgmr.msrb.gmra.mxu0 %v875_v62  ;;  %502 = vmatmul.f32.vlgmr.msrb.gmra.mxu2 %v880_v63 }
  0x64   :  { %461 = vmatmul.f32.vlgmr.msrb.gmra.mxu1 %v894_v3 }
  0x65   :  { %543 = vmatmul.f32.vlgmr.msrb.gmra.mxu3 %v901_v4 }
  0x6a   :  { %423 = vmatmul.f32.gmra.mxu0 %v935_v14  ;;  %505 = vmatmul.f32.gmra.mxu2 %v940_v15 }
  0x6c   :  { %464 = vmatmul.f32.gmra.mxu1 %v948_v17 }
  0x6d   :  { %546 = vmatmul.f32.gmra.mxu3 %v958_v19 }
  0x72   :  { %426 = vmatmul.f32.gmra.mxu0 %v993_v30  ;;  %508 = vmatmul.f32.gmra.mxu2 %v998_v31 }
  0x74   :  { %467 = vmatmul.f32.gmra.mxu1 %v1009_v34 }
  0x75   :  { %549 = vmatmul.f32.gmra.mxu3 %v1019_v36 }
  0x7a   :  { %429 = vmatmul.f32.gmra.mxu0 %v1050_v45  ;;  %511 = vmatmul.f32.gmra.mxu2 %v1055_v46 }
  0x7c   :  { %470 = vmatmul.f32.gmra.mxu1 %v1067_v49 }
  0x7d   :  { %552 = vmatmul.f32.gmra.mxu3 %v1077_v51 }
  0x82   :  { %432 = vmatmul.f32.gmra.mxu0 %v1111_v61  ;;  %514 = vmatmul.f32.gmra.mxu2 %v1116_v0 }
  0x84   :  { %473 = vmatmul.f32.gmra.mxu1 %v1127_v5 }
  0x85   :  { %555 = vmatmul.f32.gmra.mxu3 %v1137_v7 }
  0x8a   :  { %435 = vmatmul.f32.gmra.mxu0 %v1171_v22  ;;  %517 = vmatmul.f32.gmra.mxu2 %v1176_v23 }
  0x8c   :  { %476 = vmatmul.f32.gmra.mxu1 %v1187_v26 }
  0x8d   :  { %558 = vmatmul.f32.gmra.mxu3 %v1197_v28 }
  0x92   :  { %438 = vmatmul.f32.gmra.mxu0 %v38_v42  ;;  %520 = vmatmul.f32.gmra.mxu2 %v40_v43 }
  0x94   :  { %479 = vmatmul.f32.gmra.mxu1 %v39_v47 }
  0x95   :  { %561 = vmatmul.f32.gmra.mxu3 %v41_v50 }
  0x9a   :  { %441 = vmatmul.f32.gmra.mxu0 %v42_v53  ;;  %523 = vmatmul.f32.gmra.mxu2 %v44_v54 }
  0x9c   :  { %482 = vmatmul.f32.gmra.mxu1 %v43_v55 }
  0x9d   :  { %564 = vmatmul.f32.gmra.mxu3 %v45_v56 }
  0x9f   :  { %v175_v62 = vpop.f32.mrf.mxu0 }
  0xa0   :  { %v1289_v63 = vpop.permute.xlu0 %120 }
  0xa1   :  { %v176_v3 = vadd.f32 %v175_v62, %v1289_v63  ;;  %v216_v4 = vpop.f32.mrf.mxu1 }
  0xa3   :  { %v217_v14 = vadd.f32 %v216_v4, %v176_v3 }
  0xa5   :  { %v257_v15 = vpop.f32.mrf.mxu2 }
  0xa6   :  { %v258_v17 = vadd.f32 %v257_v15, %v217_v14 }
  0xa7   :  { %v178_v19 = vpop.f32.mrf.mxu0 }
  0xa8   :  { %v298_v30 = vpop.f32.mrf.mxu3  ;;  %v1292_v31 = vpop.permute.xlu0 %125 }
  0xa9   :  { %v299_v34 = vadd.f32 %v298_v30, %v258_v17  ;;  %v179_v36 = vadd.f32 %v178_v19, %v1292_v31  ;;  %v219_v45 = vpop.f32.mrf.mxu1 }
  0xab   :  { %v322_v46 = vmax.f32 %v299_v34, 0.0  ;;  %v220_v49 = vadd.f32 %v219_v45, %v179_v36  ;;  %v1295_v51 = vpop.permute.xlu1 %130 }
  0xad   :  { %331 = vst.msk [vmem:[%s1388_s3] sm:$0xff] %vm330_vm0, %v322_v46  ;;  %v260_v57 = vpop.f32.mrf.mxu2 }
  0xae   :  { %v261_v58 = vadd.f32 %v260_v57, %v220_v49  ;;  %v1309_v20 = vpop.permute.xlu2 %140 }
  0xaf   :  { %v181_v59 = vpop.f32.mrf.mxu0 }
  0xb0   :  { %v301_v60 = vpop.f32.mrf.mxu3  ;;  %v182_v61 = vadd.f32 %v181_v59, %v1295_v51 }
  0xb1   :  { %v302_v0 = vadd.f32 %v301_v60, %v261_v58  ;;  %v222_v1 = vpop.f32.mrf.mxu1 }
  0xb2   :  { %v223_v2 = vadd.f32 %v222_v1, %v182_v61 }
  0xb3   :  { %v323_v5 = vmax.f32 %v302_v0, 0.0  ;;  %v1306_v7 = vpop.permute.xlu1 %135 }
  0xb5   :  { %332 = vst.msk [vmem:[%s1388_s3 + $0x8] sm:$0xff] %vm330_vm0, %v323_v5  ;;  %v263_v6 = vpop.f32.mrf.mxu2 }
  0xb6   :  { %v264_v8 = vadd.f32 %v263_v6, %v223_v2  ;;  %v1320_v35 = vpop.permute.xlu2 %145 }
  0xb7   :  { %v184_v9 = vpop.f32.mrf.mxu0 }
  0xb8   :  { %v304_v10 = vpop.f32.mrf.mxu3  ;;  %v185_v11 = vadd.f32 %v184_v9, %v1306_v7 }
  0xb9   :  { %v305_v12 = vadd.f32 %v304_v10, %v264_v8  ;;  %v225_v13 = vpop.f32.mrf.mxu1 }
  0xba   :  { %v226_v16 = vadd.f32 %v225_v13, %v185_v11 }
  0xbb   :  { %v324_v18 = vmax.f32 %v305_v12, 0.0 }
  0xbd   :  { %333 = vst.msk [vmem:[%s1388_s3 + $0x10] sm:$0xff] %vm330_vm0, %v324_v18  ;;  %v266_v22 = vpop.f32.mrf.mxu2 }
  0xbe   :  { %v267_v23 = vadd.f32 %v266_v22, %v226_v16 }
  0xbf   :  { %v187_v24 = vpop.f32.mrf.mxu0 }
  0xc0   :  { %v307_v25 = vpop.f32.mrf.mxu3  ;;  %v188_v26 = vadd.f32 %v187_v24, %v1309_v20 }
  0xc1   :  { %v308_v27 = vadd.f32 %v307_v25, %v267_v23  ;;  %v228_v28 = vpop.f32.mrf.mxu1 }
  0xc2   :  { %v229_v29 = vadd.f32 %v228_v28, %v188_v26  ;;  %v1327_v48 = vpop.permute.xlu0 %150 }
  0xc3   :  { %v325_v32 = vmax.f32 %v308_v27, 0.0 }
  0xc5   :  { %334 = vst.msk [vmem:[%s1388_s3 + $0x18] sm:$0xff] %vm330_vm0, %v325_v32  ;;  %v269_v33 = vpop.f32.mrf.mxu2 }
  0xc6   :  { %v270_v37 = vadd.f32 %v269_v33, %v229_v29 }
  0xc7   :  { %v190_v38 = vpop.f32.mrf.mxu0  ;;  %v1334_v4 = vpop.permute.xlu1 %155 }
  0xc8   :  { %v310_v39 = vpop.f32.mrf.mxu3  ;;  %v191_v40 = vadd.f32 %v190_v38, %v1320_v35 }
  0xc9   :  { %v311_v41 = vadd.f32 %v310_v39, %v270_v37  ;;  %v231_v42 = vpop.f32.mrf.mxu1 }
  0xca   :  { %v232_v43 = vadd.f32 %v231_v42, %v191_v40 }
  0xcb   :  { %v326_v44 = vmax.f32 %v311_v41, 0.0 }
  0xcd   :  { %335 = vst.msk [vmem:[%s1388_s3 + $0x20] sm:$0xff] %vm330_vm0, %v326_v44  ;;  %v272_v47 = vpop.f32.mrf.mxu2 }
  0xce   :  { %v273_v50 = vadd.f32 %v272_v47, %v232_v43 }
  0xcf   :  { %v193_v52 = vpop.f32.mrf.mxu0 }
  0xd0   :  { %v313_v53 = vpop.f32.mrf.mxu3  ;;  %v194_v54 = vadd.f32 %v193_v52, %v1327_v48 }
  0xd1   :  { %v314_v55 = vadd.f32 %v313_v53, %v273_v50  ;;  %v234_v21 = vpop.f32.mrf.mxu1 }
  0xd2   :  { %v235_v56 = vadd.f32 %v234_v21, %v194_v54 }
  0xd3   :  { %v327_v62 = vmax.f32 %v314_v55, 0.0 }
  0xd5   :  { %336 = vst.msk [vmem:[%s1388_s3 + $0x28] sm:$0xff] %vm330_vm0, %v327_v62  ;;  %v275_v3 = vpop.f32.mrf.mxu2 }
  0xd6   :  { %v276_v14 = vadd.f32 %v275_v3, %v235_v56 }
  0xd7   :  { %v196_v15 = vpop.f32.mrf.mxu0 }
  0xd8   :  { %v316_v17 = vpop.f32.mrf.mxu3  ;;  %v197_v19 = vadd.f32 %v196_v15, %v1334_v4 }
  0xd9   :  { %v317_v30 = vadd.f32 %v316_v17, %v276_v14  ;;  %v237_v34 = vpop.f32.mrf.mxu1 }
  0xda   :  { %v238_v36 = vadd.f32 %v237_v34, %v197_v19 }
  0xdb   :  { %v328_v45 = vmax.f32 %v317_v30, 0.0 }
  0xdd   :  { %337 = vst.msk [vmem:[%s1388_s3 + $0x30] sm:$0xff] %vm330_vm0, %v328_v45  ;;  %v278_v46 = vpop.f32.mrf.mxu2 }
  0xde   :  { %v279_v49 = vadd.f32 %v278_v46, %v238_v36 }
  0xdf   :  { %v421_v57 = vpop.f32.mrf.mxu0 }
  0xe0   :  { %v319_v58 = vpop.f32.mrf.mxu3  ;;  %v422_v59 = vadd.f32 %v421_v57, %v1289_v63 }
  0xe1   :  { %v320_v60 = vadd.f32 %v319_v58, %v279_v49  ;;  %v462_v61 = vpop.f32.mrf.mxu1 }
  0xe2   :  { %v463_v0 = vadd.f32 %v462_v61, %v422_v59 }
  0xe3   :  { %v329_v1 = vmax.f32 %v320_v60, 0.0 }
  0xe5   :  { %338 = vst.msk [vmem:[%s1388_s3 + $0x38] sm:$0xff] %vm330_vm0, %v329_v1  ;;  %v503_v2 = vpop.f32.mrf.mxu2 }
  0xe6   :  { %v504_v5 = vadd.f32 %v503_v2, %v463_v0 }
  0xe7   :  { %v424_v6 = vpop.f32.mrf.mxu0 }
  0xe8   :  { %v425_v8 = vadd.f32 %v424_v6, %v1292_v31  ;;  %v544_v9 = vpop.f32.mrf.mxu3 }
  0xe9   :  { %v545_v10 = vadd.f32 %v544_v9, %v504_v5  ;;  %v465_v11 = vpop.f32.mrf.mxu1 }
  0xea   :  { %v466_v12 = vadd.f32 %v465_v11, %v425_v8 }
  0xeb   :  { %v568_v13 = vmax.f32 %v545_v10, 0.0 }
  0xed   :  { %653 = vst.msk [vmem:[%s1388_s3 + $0x40] sm:$0xff] %vm330_vm0, %v568_v13  ;;  %v506_v63 = vpop.f32.mrf.mxu2 }
  0xee   :  { %v507_v16 = vadd.f32 %v506_v63, %v466_v12 }
  0xef   :  { %v427_v18 = vpop.f32.mrf.mxu0 }
  0xf0   :  { %v428_v22 = vadd.f32 %v427_v18, %v1295_v51  ;;  %v547_v23 = vpop.f32.mrf.mxu3 }
  0xf1   :  { %v548_v24 = vadd.f32 %v547_v23, %v507_v16  ;;  %v468_v25 = vpop.f32.mrf.mxu1 }
  0xf2   :  { %v469_v26 = vadd.f32 %v468_v25, %v428_v22 }
  0xf3   :  { %v569_v31 = vmax.f32 %v548_v24, 0.0 }
  0xf5   :  { %654 = vst.msk [vmem:[%s1388_s3 + $0x48] sm:$0xff] %vm330_vm0, %v569_v31  ;;  %v509_v27 = vpop.f32.mrf.mxu2 }
  0xf6   :  { %v510_v28 = vadd.f32 %v509_v27, %v469_v26 }
  0xf7   :  { %v430_v29 = vpop.f32.mrf.mxu0 }
  0xf8   :  { %v431_v32 = vadd.f32 %v430_v29, %v1306_v7  ;;  %v550_v33 = vpop.f32.mrf.mxu3 }
  0xf9   :  { %v551_v37 = vadd.f32 %v550_v33, %v510_v28  ;;  %v471_v38 = vpop.f32.mrf.mxu1 }
  0xfa   :  { %v472_v39 = vadd.f32 %v471_v38, %v431_v32 }
  0xfb   :  { %v570_v51 = vmax.f32 %v551_v37, 0.0 }
  0xfd   :  { %655 = vst.msk [vmem:[%s1388_s3 + $0x50] sm:$0xff] %vm330_vm0, %v570_v51  ;;  %v512_v40 = vpop.f32.mrf.mxu2 }
  0xfe   :  { %v513_v41 = vadd.f32 %v512_v40, %v472_v39 }
  0xff   :  { %v433_v42 = vpop.f32.mrf.mxu0 }
 0x100   :  { %v434_v43 = vadd.f32 %v433_v42, %v1309_v20  ;;  %v553_v44 = vpop.f32.mrf.mxu3 }
 0x101   :  { %v554_v47 = vadd.f32 %v553_v44, %v513_v41  ;;  %v474_v50 = vpop.f32.mrf.mxu1 }
 0x102   :  { %v475_v52 = vadd.f32 %v474_v50, %v434_v43 }
 0x103   :  { %v571_v7 = vmax.f32 %v554_v47, 0.0 }
 0x105   :  { %656 = vst.msk [vmem:[%s1388_s3 + $0x58] sm:$0xff] %vm330_vm0, %v571_v7  ;;  %v515_v53 = vpop.f32.mrf.mxu2 }
 0x106   :  { %v516_v54 = vadd.f32 %v515_v53, %v475_v52 }
 0x107   :  { %v436_v55 = vpop.f32.mrf.mxu0 }
 0x108   :  { %v437_v21 = vadd.f32 %v436_v55, %v1320_v35  ;;  %v556_v56 = vpop.f32.mrf.mxu3 }
 0x109   :  { %v557_v62 = vadd.f32 %v556_v56, %v516_v54  ;;  %v477_v3 = vpop.f32.mrf.mxu1 }
 0x10a   :  { %v478_v14 = vadd.f32 %v477_v3, %v437_v21 }
 0x10b   :  { %v572_v20 = vmax.f32 %v557_v62, 0.0 }
 0x10d   :  { %657 = vst.msk [vmem:[%s1388_s3 + $0x60] sm:$0xff] %vm330_vm0, %v572_v20  ;;  %v518_v15 = vpop.f32.mrf.mxu2 }
 0x10e   :  { %v519_v17 = vadd.f32 %v518_v15, %v478_v14 }
 0x10f   :  { %v439_v19 = vpop.f32.mrf.mxu0 }
 0x110   :  { %v440_v30 = vadd.f32 %v439_v19, %v1327_v48  ;;  %v559_v34 = vpop.f32.mrf.mxu3 }
 0x111   :  { %v560_v36 = vadd.f32 %v559_v34, %v519_v17  ;;  %v480_v45 = vpop.f32.mrf.mxu1 }
 0x112   :  { %v481_v35 = vadd.f32 %v480_v45, %v440_v30 }
 0x113   :  { %v573_v46 = vmax.f32 %v560_v36, 0.0 }
 0x115   :  { %658 = vst.msk [vmem:[%s1388_s3 + $0x68] sm:$0xff] %vm330_vm0, %v573_v46  ;;  %v521_v49 = vpop.f32.mrf.mxu2 }
 0x116   :  { %v522_v57 = vadd.f32 %v521_v49, %v481_v35 }
 0x117   :  { %v442_v58 = vpop.f32.mrf.mxu0 }
 0x118   :  { %v443_v59 = vadd.f32 %v442_v58, %v1334_v4  ;;  %v562_v60 = vpop.f32.mrf.mxu3 }
 0x119   :  { %v563_v61 = vadd.f32 %v562_v60, %v522_v57  ;;  %v483_v0 = vpop.f32.mrf.mxu1 }
 0x11a   :  { %v484_v48 = vadd.f32 %v483_v0, %v443_v59 }
 0x11b   :  { %v574_v1 = vmax.f32 %v563_v61, 0.0 }
 0x11d   :  { %659 = vst.msk [vmem:[%s1388_s3 + $0x70] sm:$0xff] %vm330_vm0, %v574_v1  ;;  %v524_v2 = vpop.f32.mrf.mxu2 }
 0x11e   :  { %v525_v5 = vadd.f32 %v524_v2, %v484_v48 }
 0x120   :  { %v565_v6 = vpop.f32.mrf.mxu3 }
 0x121   :  { %v566_v8 = vadd.f32 %v565_v6, %v525_v5 }
 0x123   :  { %v575_v9 = vmax.f32 %v566_v8, 0.0 }
 0x125   :  { %660 = vst.msk [vmem:[%s1388_s3 + $0x78] sm:$0xff] %vm330_vm0, %v575_v9 }

</bundles_post_ra>
